<compile_context>
chip_gen: v6e
topology: v6e:2x2x1
jax: 0.10.0
libtpu: 0.0.40
codegen_flags: <defaults>
</compile_context>

<pallas_src>
import jax
import jax.numpy as jnp
from jax.experimental import pallas as pl
from jax.experimental.pallas import tpu as pltpu


def _round_up(x, m):
    return (x + m - 1) // m * m


def actor_critic_kernel(x_ref, w1_ref, b1_ref, w2_ref, b2_ref, out_ref):
    # x_ref  : (TB, num_inputs)      bf16
    # w1_ref : (num_inputs, 2H)      bf16   [critic_l1 | actor_l1] fused
    # b1_ref : (1, 2H)               f32
    # w2_ref : (2H, OUT_PAD)         bf16   block-diagonal 2nd layer, zero padded
    # b2_ref : (1, OUT_PAD)          f32
    # out_ref: (TB, OUT_PAD)         f32    lanes [0:no]=mu, lane no=value, rest 0
    x = x_ref[...]
    # single fused first-layer GEMM for both heads (shared LHS)
    h = jnp.dot(x, w1_ref[...], preferred_element_type=jnp.float32) + b1_ref[...]
    h = jnp.maximum(h, 0.0)  # fp32 ReLU on the VPU (v5e has no bf16 VPU path)
    # single fused second-layer GEMM -> lane-dense output slab
    out = jnp.dot(h.astype(w2_ref.dtype), w2_ref[...],
                  preferred_element_type=jnp.float32) + b2_ref[...]
    out_ref[...] = out.astype(out_ref.dtype)


def _pack_params(params, out_pad):
    """Fuse per-head weights into the kernel's packed layout (done once, in JAX)."""
    num_inputs, hidden = params["wc1"].shape
    num_outputs = params["wa2"].shape[1]

    # first layer: concat along output dim -> h[:, :H] = critic hidden, h[:, H:] = actor hidden
    w1 = jnp.concatenate([params["wc1"], params["wa1"]], axis=1)        # (in, 2H)
    b1 = jnp.concatenate([params["bc1"], params["ba1"]], axis=1)        # (1, 2H)

    # second layer: block-diagonal, zero-padded to a lane-dense 128-wide output
    w2 = jnp.zeros((2 * hidden, out_pad), jnp.float32)
    w2 = w2.at[hidden:, :num_outputs].set(params["wa2"])                # mu   <- actor hidden
    w2 = w2.at[:hidden, num_outputs].set(params["wc2"][:, 0])           # value<- critic hidden
    b2 = jnp.zeros((1, out_pad), jnp.float32)
    b2 = b2.at[0, :num_outputs].set(params["ba2"][0])
    b2 = b2.at[0, num_outputs].set(params["bc2"][0, 0])

    # bf16 MXU operands, fp32 biases (added after fp32 accumulation)
    return w1.astype(jnp.bfloat16), b1, w2.astype(jnp.bfloat16), b2


def actor_critic_forward(x, params, *, block_batch=1024):
    """Returns (mu, std, value): the Normal(mu, std) parameters + critic value,
    matching ActorCritic.forward semantics."""
    batch, num_inputs = x.shape
    num_outputs = params["wa2"].shape[1]
    out_pad = _round_up(num_outputs + 1, 128)      # mu || value, padded lane-dense

    w1, b1, w2, b2 = _pack_params(params, out_pad)
    xb = x.astype(jnp.bfloat16)                    # halves HBM traffic on the batch input

    # batch tile: full batch if small, otherwise pipelined tiles of block_batch rows
    tb = batch if batch <= block_batch else block_batch
    grid = (pl.cdiv(batch, tb),)

    const = lambda shape: pl.BlockSpec(shape, lambda i: (0,) * len(shape))  # VMEM-resident

    out = pl.pallas_call(
        actor_critic_kernel,
        out_shape=jax.ShapeDtypeStruct((batch, out_pad), jnp.float32),
        grid=grid,
        in_specs=[
            pl.BlockSpec((tb, num_inputs), lambda i: (i, 0)),   # x, batch-tiled
            const(w1.shape), const(b1.shape),
            const(w2.shape), const(b2.shape),
        ],
        out_specs=pl.BlockSpec((tb, out_pad), lambda i: (i, 0)),
        compiler_params=pltpu.CompilerParams(
            dimension_semantics=("parallel",),       # shard batch tiles across TCs on v7x
            vmem_limit_bytes=32 * 1024 * 1024,       # safe on v7x's 64 MiB VMEM
        ),
    )(xb, w1, b1, w2, b2)

    mu = out[:, :num_outputs]
    value = out[:, num_outputs:num_outputs + 1]
    # std is x-independent: broadcast outside the kernel (no per-row HBM writeback)
    std = jnp.broadcast_to(jnp.exp(params["log_std"]), mu.shape)
    # TODO(synk): torch.distributions.Normal object itself has no Pallas analog;
    # the kernel returns its parameters (mu, std) plus the critic value.
    return mu, std, value


def init_params(key, num_inputs, num_outputs, hidden_size, std=0.0):
    """Matches init_weights: W ~ N(0, 0.1), b = 0.1, log_std = std * ones(1, num_outputs).
    Weights stored pre-transposed as (in, out) == PyTorch weight.T."""
    ks = jax.random.split(key, 4)
    return {
        "wc1": 0.1 * jax.random.normal(ks[0], (num_inputs, hidden_size), jnp.float32),
        "bc1": jnp.full((1, hidden_size), 0.1, jnp.float32),
        "wc2": 0.1 * jax.random.normal(ks[1], (hidden_size, 1), jnp.float32),
        "bc2": jnp.full((1, 1), 0.1, jnp.float32),
        "wa1": 0.1 * jax.random.normal(ks[2], (num_inputs, hidden_size), jnp.float32),
        "ba1": jnp.full((1, hidden_size), 0.1, jnp.float32),
        "wa2": 0.1 * jax.random.normal(ks[3], (hidden_size, num_outputs), jnp.float32),
        "ba2": jnp.full((1, num_outputs), 0.1, jnp.float32),
        "log_std": jnp.full((1, num_outputs), std, jnp.float32),
    }


if __name__ == "__main__":
    key = jax.random.PRNGKey(0)
    batch, num_inputs, num_outputs, hidden_size = 8, 16, 4, 32

    pkey, xkey = jax.random.split(key)
    params = init_params(pkey, num_inputs, num_outputs, hidden_size, std=0.0)
    x = jax.random.normal(xkey, (batch, num_inputs), jnp.float32)

    mu, std, value = actor_critic_forward(x, params)
    jax.block_until_ready((mu, std, value))

    # Reference 1: mirrors the kernel's bf16-MXU / fp32-accumulate math exactly.
    def ref_bf16(x, p):
        xb = x.astype(jnp.bfloat16)
        hc = jnp.maximum(jnp.dot(xb, p["wc1"].astype(jnp.bfloat16),
                                 preferred_element_type=jnp.float32) + p["bc1"], 0.0)
        ha = jnp.maximum(jnp.dot(xb, p["wa1"].astype(jnp.bfloat16),
                                 preferred_element_type=jnp.float32) + p["ba1"], 0.0)
        v = jnp.dot(hc.astype(jnp.bfloat16), p["wc2"].astype(jnp.bfloat16),
                    preferred_element_type=jnp.float32) + p["bc2"]
        m = jnp.dot(ha.astype(jnp.bfloat16), p["wa2"].astype(jnp.bfloat16),
                    preferred_element_type=jnp.float32) + p["ba2"]
        s = jnp.broadcast_to(jnp.exp(p["log_std"]), m.shape)
        return m, s, v

    # Reference 2: pure fp32 module math (loose tolerance covers bf16 operand cast).
    def ref_f32(x, p):
        hc = jnp.maximum(x @ p["wc1"] + p["bc1"], 0.0)
        v = hc @ p["wc2"] + p["bc2"]
        ha = jnp.maximum(x @ p["wa1"] + p["ba1"], 0.0)
        m = ha @ p["wa2"] + p["ba2"]
        s = jnp.broadcast_to(jnp.exp(p["log_std"]), m.shape)
        return m, s, v

    rm, rs, rv = ref_bf16(x, params)
    assert jnp.allclose(mu, rm, atol=1e-4, rtol=1e-4)
    assert jnp.allclose(std, rs, atol=1e-5)
    assert jnp.allclose(value, rv, atol=1e-4, rtol=1e-4)

    fm, fs, fv = ref_f32(x, params)
    assert jnp.allclose(mu, fm, atol=5e-2)
    assert jnp.allclose(std, fs, atol=1e-5)
    assert jnp.allclose(value, fv, atol=5e-2)

    print("KERNEL_OK")
</pallas_src>

<mosaic_0001>
module attributes {stable_mosaic.version = 11 : i64} {
  func.func @actor_critic_kernel(%arg0: i32, %arg1: memref<8x16xbf16, #tpu.memory_space<vmem>>, %arg2: memref<16x64xbf16, #tpu.memory_space<vmem>>, %arg3: memref<1x64xf32, #tpu.memory_space<vmem>>, %arg4: memref<64x128xbf16, #tpu.memory_space<vmem>>, %arg5: memref<1x128xf32, #tpu.memory_space<vmem>>, %arg6: memref<8x128xf32, #tpu.memory_space<vmem>>) attributes {dimension_semantics = [#tpu.dimension_semantics<parallel>], iteration_bounds = array<i64: 1>, scalar_prefetch = 0 : i64, scratch_operands = 0 : i64, tpu.core_type = #tpu.core_type<tc>, window_params = [{transform_indices = @transform_0, window_bounds = array<i64: 8, 16>}, {pipeline_mode = #tpu.pipeline_mode<synchronous>, transform_indices = @transform_1, window_bounds = array<i64: 16, 64>}, {pipeline_mode = #tpu.pipeline_mode<synchronous>, transform_indices = @transform_2, window_bounds = array<i64: 1, 64>}, {pipeline_mode = #tpu.pipeline_mode<synchronous>, transform_indices = @transform_3, window_bounds = array<i64: 64, 128>}, {pipeline_mode = #tpu.pipeline_mode<synchronous>, transform_indices = @transform_4, window_bounds = array<i64: 1, 128>}, {transform_indices = @transform_5, window_bounds = array<i64: 8, 128>}]} {
    %c0 = arith.constant 0 : index
    %c0_0 = arith.constant 0 : index
    %0 = vector.load %arg1[%c0, %c0_0] : memref<8x16xbf16, #tpu.memory_space<vmem>>, vector<8x16xbf16>
    %c0_1 = arith.constant 0 : index
    %c0_2 = arith.constant 0 : index
    %1 = vector.load %arg2[%c0_1, %c0_2] : memref<16x64xbf16, #tpu.memory_space<vmem>>, vector<16x64xbf16>
    %cst = arith.constant dense<0.000000e+00> : vector<8x64xf32>
    %2 = tpu.matmul %0, %1, %cst {dimension_numbers = #tpu.dot_dimension_numbers<[1], [0], [0], [1], [0, 0, 1, 1], [], []>} : vector<8x16xbf16>, vector<16x64xbf16>, vector<8x64xf32> -> vector<8x64xf32>
    %c0_3 = arith.constant 0 : index
    %c0_4 = arith.constant 0 : index
    %3 = vector.load %arg3[%c0_3, %c0_4] : memref<1x64xf32, #tpu.memory_space<vmem>>, vector<1x64xf32>
    %4 = vector.broadcast %3 : vector<1x64xf32> to vector<8x64xf32>
    %5 = arith.addf %2, %4 : vector<8x64xf32>
    %cst_5 = arith.constant 0.000000e+00 : f32
    %6 = vector.broadcast %cst_5 : f32 to vector<8x64xf32>
    %7 = arith.maximumf %5, %6 : vector<8x64xf32>
    %8 = arith.truncf %7 : vector<8x64xf32> to vector<8x64xbf16>
    %c0_6 = arith.constant 0 : index
    %c0_7 = arith.constant 0 : index
    %9 = vector.load %arg4[%c0_6, %c0_7] : memref<64x128xbf16, #tpu.memory_space<vmem>>, vector<64x128xbf16>
    %cst_8 = arith.constant dense<0.000000e+00> : vector<8x128xf32>
    %10 = tpu.matmul %8, %9, %cst_8 {dimension_numbers = #tpu.dot_dimension_numbers<[1], [0], [0], [1], [0, 0, 1, 1], [], []>} : vector<8x64xbf16>, vector<64x128xbf16>, vector<8x128xf32> -> vector<8x128xf32>
    %c0_9 = arith.constant 0 : index
    %c0_10 = arith.constant 0 : index
    %11 = vector.load %arg5[%c0_9, %c0_10] : memref<1x128xf32, #tpu.memory_space<vmem>>, vector<1x128xf32>
    %12 = vector.broadcast %11 : vector<1x128xf32> to vector<8x128xf32>
    %13 = arith.addf %10, %12 : vector<8x128xf32>
    %c0_11 = arith.constant 0 : index
    %c0_12 = arith.constant 0 : index
    %14 = vector.load %arg6[%c0_11, %c0_12] : memref<8x128xf32, #tpu.memory_space<vmem>>, vector<8x128xf32>
    tpu.vector_store %arg6[%c0_11, %c0_12], %13 {strides = array<i32>} : memref<8x128xf32, #tpu.memory_space<vmem>>, vector<8x128xf32>,
    return
  }
  func.func @transform_0(%arg0: i32) -> (i32, i32) {
    %c0_i32 = arith.constant 0 : i32
    %c0_i32_0 = arith.constant 0 : i32
    return %arg0, %c0_i32 : i32, i32
  }
  func.func @transform_1(%arg0: i32) -> (i32, i32) {
    %c0_i32 = arith.constant 0 : i32
    %c0_i32_0 = arith.constant 0 : i32
    %c0_i32_1 = arith.constant 0 : i32
    return %c0_i32, %c0_i32_0 : i32, i32
  }
  func.func @transform_2(%arg0: i32) -> (i32, i32) {
    %c0_i32 = arith.constant 0 : i32
    %c0_i32_0 = arith.constant 0 : i32
    %c0_i32_1 = arith.constant 0 : i32
    return %c0_i32, %c0_i32_0 : i32, i32
  }
  func.func @transform_3(%arg0: i32) -> (i32, i32) {
    %c0_i32 = arith.constant 0 : i32
    %c0_i32_0 = arith.constant 0 : i32
    %c0_i32_1 = arith.constant 0 : i32
    return %c0_i32, %c0_i32_0 : i32, i32
  }
  func.func @transform_4(%arg0: i32) -> (i32, i32) {
    %c0_i32 = arith.constant 0 : i32
    %c0_i32_0 = arith.constant 0 : i32
    %c0_i32_1 = arith.constant 0 : i32
    return %c0_i32, %c0_i32_0 : i32, i32
  }
  func.func @transform_5(%arg0: i32) -> (i32, i32) {
    %c0_i32 = arith.constant 0 : i32
    %c0_i32_0 = arith.constant 0 : i32
    return %arg0, %c0_i32 : i32, i32
  }
}

</mosaic_0001>

<bundles_post_ra>
// kernel: tpu_custom_call.1
= control target key start
LH: loop header
LB: loop body
LE: loop exit
PB: predicated region body
PF: predicated region fallthrough
CT: control target
= control target key end

     0   :  { %10 = vsyncpa [#allocation3], 0  ;;  %s412_s0 = inlined_call_operand.hbm [shape: bf16[8,16], index: 0, kind: input, shape index: {}]   ;;  %s413_s1 = inlined_call_operand.hbm [shape: bf16[16,64], index: 1, kind: input, shape index: {}]   ;;  %s414_s2 = inlined_call_operand.vmem [shape: f32[1,64], index: 2, kind: input, shape index: {}]   ;;  %s415_s3 = inlined_call_operand.hbm [shape: bf16[64,128], index: 3, kind: input, shape index: {}]   ;;  %s416_s4 = inlined_call_operand.vmem [shape: f32[1,128], index: 4, kind: input, shape index: {}]   ;;  %s417_s5 = inlined_call_operand.hbm [shape: f32[8,128], index: 5, kind: output, shape index: {}]  }
   0x1   :  { %11 = vsyncpa [#allocation6], 0 }
   0x2   :  { %12 = vsyncpa [#allocation4], 0  ;;  %s356_s18 = smov [#allocation5]  }
   0x3   :  { %s28_s19 = sshll.u32 %s356_s18, 4  ;;  %s29_s19 = int_to_ptr.vmem [resolvable:$true] %s28_s19 }
   0x4   :  { %s278_s20 = scalar_lea.vmem %s29_s19, 128  ;;  %p283_p1 = scmp.lt.s32.totalorder %s29_s19, %s29_s19 }
   0x5   :  { %p279_p0 = scmp.ne.s32.totalorder %s29_s19, %s278_s20  ;;  %p284_p2 = scmp.lt.s32.totalorder %s278_s20, %s278_s20 }
   0x7   :  { %p285_p3 = por %p284_p2, %p283_p1 }
   0x9   :  { %p286_p4 = pnand %p285_p3, %p279_p0 }
   0xb   :  { %289 = shalt.err (!%p286_p4)
}
   0xc   :  { %s357_s21 = smov 64   ;;  %s358_s22 = smov 4  }
   0xd   :  { %34 = dma.hbm_to_vmem [thread:$0]  %s413_s1, 128, %s29_s19, [#allocation6], %s357_s21, %s357_s21, %s358_s22  }
   0xe   :  { %s359_s25 = smov [#allocation2]   ;;  %s360_s27 = smov [#allocation7]  }
   0xf   :  { %s19_s26 = sshll.u32 %s359_s25, 4  ;;  %s42_s28 = sshll.u32 %s360_s27, 4  ;;  %s20_s26 = int_to_ptr.vmem [resolvable:$true] %s19_s26  ;;  %s43_s28 = int_to_ptr.vmem [resolvable:$true] %s42_s28 }
  0x10   :  { %s298_s29 = scalar_lea.vmem %s20_s26, 64  ;;  %p303_p6 = scmp.lt.s32.totalorder %s20_s26, %s20_s26 }
  0x11   :  { %p299_p5 = scmp.ne.s32.totalorder %s20_s26, %s298_s29  ;;  %p304_p7 = scmp.lt.s32.totalorder %s298_s29, %s298_s29 }
  0x13   :  { %p305_p8 = por %p304_p7, %p303_p6 }
  0x15   :  { %p306_p9 = pnand %p305_p8, %p299_p5 }
  0x17   :  { %309 = shalt.err (!%p306_p9)
}
  0x18   :  { %22 = dma.hbm_to_vmem [thread:$0]  %s412_s0, 64, %s20_s26, [#allocation3]  }
  0x19   :  { %s318_s7 = scalar_lea.vmem %s43_s28, 512  ;;  %p323_p11 = scmp.lt.s32.totalorder %s43_s28, %s43_s28 }
  0x1a   :  { %p319_p10 = scmp.ne.s32.totalorder %s43_s28, %s318_s7  ;;  %p324_p12 = scmp.lt.s32.totalorder %s318_s7, %s318_s7 }
  0x1c   :  { %p325_p13 = por %p324_p12, %p323_p11 }
  0x1e   :  { %p326_p0 = pnand %p325_p13, %p319_p10 }
  0x20   :  { %329 = shalt.err (!%p326_p0)
}
  0x21   :  { %48 = dma.hbm_to_vmem [thread:$0]  %s415_s3, 512, %s43_s28, [#allocation6], %s357_s21, %s357_s21, %s358_s22  }
  0x22   :  { %350 = dma.done.wait [#allocation3], 64  }
  0x23   :  { %351 = vsyncadd [#allocation3], 4294967232 }
  0x24   :  { %352 = dma.done.wait [#allocation6], 640  }
  0x25   :  { %353 = vsyncadd [#allocation6], 4294966656  ;;  %v361_v0 = vmov 0.0   ;;  %vm362_vm0 = vmmov 0   ;;  %v265_v1 = vld [vmem:[#allocation5] sm:$0xff]   ;;  %vm77_vm1 = vcmask 130048  }
  0x26   :  { %239 = vmatprep.subr.bf16.mxu0 %v361_v0  ;;  %241 = vmatprep.mubr.msk.bf16.mxu0 %vm362_vm0, %v361_v0  ;;  %v61_v2 = vld [vmem:[#allocation2] sm:$0xf]  ;;  %v266_v3 = vld [vmem:[#allocation7 + $0x18] sm:$0xff]   ;;  %v268_v5 = vld [vmem:[#allocation7 + $0x8] sm:$0xff]   ;;  %vm162_vm2 = vcmask 523264   ;;  %s363_s11 = smov [#allocation8]  }
  0x27   :  { %245 = vmatprep.subr.bf16.mxu1 %v361_v0  ;;  %253 = vmatprep.mubr.msk.bf16.mxu1 %vm362_vm0, %v361_v0  ;;  %v267_v4 = vld [vmem:[#allocation7 + $0x10] sm:$0xff]   ;;  %v269_v6 = vld [vmem:[#allocation7] sm:$0xff]   ;;  %s213_s12 = sshll.u32 %s363_s11, 4  ;;  %s214_s12 = int_to_ptr.vmem [resolvable:$true] %s213_s12 }
  0x28   :  { %240 = vmatpush3.bf16.msra.mxu0 %v265_v1  ;;  %246 = vmatpush3.bf16.msra.mxu1 %v266_v3  ;;  %v223_v7 = vld [vmem:[%s414_s2] ss:$0 sm:$0xff]  ;;  %s330_s2 = scalar_lea.vmem %s214_s12, 128  ;;  %p335_p2 = scmp.lt.s32.totalorder %s214_s12, %s214_s12 }
  0x29   :  { %247 = vmatprep.subr.bf16.mxu1 %v361_v0  ;;  %v226_v15 = vld [vmem:[%s416_s4] ss:$0 sm:$0xff]  ;;  %p331_p1 = scmp.ne.s32.totalorder %s214_s12, %s330_s2  ;;  %p336_p3 = scmp.lt.s32.totalorder %s330_s2, %s330_s2 }
  0x2b   :  { %242 = vmatmul.mubr.msk.bf16.vlgmr.msra.gmra.mxu0 %vm77_vm1, %v61_v2  ;;  %p337_p4 = por %p336_p3, %p335_p2 }
  0x2c   :  { %248 = vmatpush3.bf16.msra.mxu1 %v267_v4 }
  0x2d   :  { %249 = vmatprep.subr.bf16.mxu1 %v361_v0  ;;  %p338_p5 = pnand %p337_p4, %p331_p1 }
  0x30   :  { %250 = vmatpush3.bf16.msra.mxu1 %v268_v5 }
  0x31   :  { %251 = vmatprep.subr.bf16.mxu1 %v361_v0 }
  0x34   :  { %252 = vmatpush3.bf16.msra.mxu1 %v269_v6 }
  0xeb   :  { %v115_v8 = vpop.f32.mrf.mxu0 }
  0xec   :  { %v116_v9 = vadd.f32 %v223_v7, %v115_v8 }
  0xed   :  { %v243_v10 = vpop.f32.mrf.mxu0 }
  0xee   :  { %v121_v11 = vmax.f32 %v116_v9, 0.0 }
  0xef   :  { %v118_v12 = vpop.f32.mrf.mxu0 }
  0xf0   :  { %v122_v13 = vpack.c.bf16 %v121_v11, %v121_v11 }
  0xf1   :  { %v244_v14 = vpop.f32.mrf.mxu0 }
  0xf2   :  { %254 = vmatmul.mubr.msk.bf16.vlgmr.msra.gmra.mxu1 %vm162_vm2, %v122_v13 }
 0x1b2   :  { %v200_v16 = vpop.f32.mrf.mxu1 }
 0x1b3   :  { %v201_v17 = vadd.f32 %v226_v15, %v200_v16 }
 0x1b4   :  { %v255_v18 = vpop.f32.mrf.mxu1 }
 0x1b5   :  { %206 = vst [vmem:[#allocation8] sm:$0xff] %v201_v17 }
 0x1b6   :  { %v203_v19 = vpop.f32.mrf.mxu1 }
 0x1b7   :  { %341 = shalt.err (!%p338_p5)
}
 0x1b8   :  { %216 = dma.vmem_to_hbm [thread:$0]  %s214_s12, 128, %s417_s5, [#allocation4]   ;;  %v256_v20 = vpop.f32.mrf.mxu1 }
 0x1b9   :  { %354 = dma.done.wait [#allocation4], 128  }
 0x1ba   :  { %355 = vsyncadd [#allocation4], 4294967168 }
 0x1bb   :  { %220 = vsyncpa [#allocation3], 1 }
 0x1bc   :  { %221 = vsyncpa [#allocation6], 1 }
 0x1bd   :  { %222 = vsyncpa [#allocation4], 1 }

</bundles_post_ra>
